<compile_context>
chip_gen: v6e
topology: v6e:2x2x1
jax: 0.10.0
libtpu: 0.0.40
codegen_flags: <defaults>
</compile_context>

<pallas_src>
import functools

import jax
import jax.numpy as jnp
from jax.experimental import pallas as pl
from jax.experimental.pallas import tpu as pltpu


def _project_normalize_kernel(x_ref, w_ref, b_ref, z_ref, *, eps):
    """z = normalize(x @ W + b, dim=-1) for one row tile."""
    y = jnp.dot(x_ref[...], w_ref[...], preferred_element_type=jnp.float32)
    y = y + b_ref[...]
    norm = jnp.sqrt(jnp.sum(y * y, axis=-1, keepdims=True))
    z_ref[...] = (y / jnp.maximum(norm, eps)).astype(z_ref.dtype)


def _nce_loss_kernel(zq_ref, zk_ref, out_ref, m_ref, l_ref, tgt_ref,
                     *, inv_t, tile_q, tile_k):
    """Online-logsumexp InfoNCE loss for one (query tile, key tile) block.

    The similarity block is key-major (tile_k, tile_q): queries sit on the
    128-wide lane axis, so exp / max / sum are lane-dense and the running
    stats are (1, tile_q) lane-dense VMEM vectors.
    """
    i = pl.program_id(0)
    j = pl.program_id(1)

    @pl.when(j == 0)
    def _():
        m_ref[...] = jnp.full_like(m_ref, -jnp.inf)
        l_ref[...] = jnp.zeros_like(l_ref)
        tgt_ref[...] = jnp.zeros_like(tgt_ref)

    # (tile_k, E) @ (tile_q, E)^T contracted over E -> (tile_k, tile_q) on MXU.
    s = jax.lax.dot_general(
        zk_ref[...], zq_ref[...],
        dimension_numbers=(((1,), (1,)), ((), ())),
        preferred_element_type=jnp.float32)
    if inv_t != 1.0:
        s = s * inv_t

    key_ids = jax.lax.broadcasted_iota(jnp.int32, (tile_k, tile_q), 0) + j * tile_k
    qry_ids = jax.lax.broadcasted_iota(jnp.int32, (tile_k, tile_q), 1) + i * tile_q

    # Target logit: partner of query q is q ^ 1 (targets = [1,0,3,2,...]).
    # Exactly one key block contains it, so summing masked contributions works
    # for any tiling, even when a pair straddles a tile boundary.
    tgt_mask = key_ids == (qry_ids ^ 1)
    tgt_ref[...] += jnp.sum(jnp.where(tgt_mask, s, 0.0), axis=0, keepdims=True)

    # Exclude self-similarity (fill_diagonal_(-inf)) from the log-sum-exp.
    s = jnp.where(key_ids == qry_ids, -jnp.inf, s)

    m_prev = m_ref[...]
    m_new = jnp.maximum(m_prev, jnp.max(s, axis=0, keepdims=True))
    alpha = jnp.exp(m_prev - m_new)
    l_ref[...] = alpha * l_ref[...] + jnp.sum(jnp.exp(s - m_new), axis=0,
                                              keepdims=True)
    m_ref[...] = m_new

    @pl.when(j == pl.num_programs(1) - 1)
    def _():
        # cross_entropy = logsumexp(row) - logit[target]
        loss = m_ref[...] + jnp.log(l_ref[...]) - tgt_ref[...]   # (1, tile_q)
        out_ref[...] = loss.reshape(1, 1, tile_q).astype(out_ref.dtype)


def nce_loss_forward(x, weight, bias, *, temperature=1.0,
                     tile_q=None, tile_k=None):
    """x: (n, dim); weight: (embed_dim, dim) PyTorch Linear layout; bias: (embed_dim,)."""
    n, d = x.shape
    e, d2 = weight.shape
    assert d2 == d
    assert n % 2 == 0, "NCE pairing requires an even number of rows"

    if tile_q is None:
        tile_q = min(512, n)
    if tile_k is None:
        tile_k = min(512, n)
    assert n % tile_q == 0 and n % tile_k == 0
    assert tile_q == n or tile_q % 128 == 0
    assert tile_k == n or tile_k % 128 == 0

    wt = weight.T                     # (d, e)
    b2 = bias.reshape(1, e)
    grid_r = n // tile_q
    grid_c = n // tile_k

    # Stage 1: z = normalize(x @ W^T + b), tiled over rows.
    z = pl.pallas_call(
        functools.partial(_project_normalize_kernel, eps=1e-12),
        out_shape=jax.ShapeDtypeStruct((n, e), jnp.float32),
        grid_spec=pltpu.PrefetchScalarGridSpec(
            num_scalar_prefetch=0,
            grid=(grid_r,),
            in_specs=[
                pl.BlockSpec((tile_q, d), lambda i: (i, 0)),   # x row tile
                pl.BlockSpec((d, e), lambda i: (0, 0)),        # W (resident)
                pl.BlockSpec((1, e), lambda i: (0, 0)),        # bias (resident)
            ],
            out_specs=pl.BlockSpec((tile_q, e), lambda i: (i, 0)),
        ),
        compiler_params=pltpu.CompilerParams(
            dimension_semantics=("parallel",)),
    )(x, wt, b2)

    # Stage 2: per-row InfoNCE loss, online logsumexp over key tiles.
    losses = pl.pallas_call(
        functools.partial(_nce_loss_kernel, inv_t=float(1.0 / temperature),
                          tile_q=tile_q, tile_k=tile_k),
        out_shape=jax.ShapeDtypeStruct((grid_r, 1, tile_q), jnp.float32),
        grid_spec=pltpu.PrefetchScalarGridSpec(
            num_scalar_prefetch=0,
            grid=(grid_r, grid_c),
            in_specs=[
                pl.BlockSpec((tile_q, e), lambda i, j: (i, 0)),  # query rows
                pl.BlockSpec((tile_k, e), lambda i, j: (j, 0)),  # key rows
            ],
            out_specs=pl.BlockSpec((1, 1, tile_q), lambda i, j: (i, 0, 0)),
            scratch_shapes=[
                pltpu.VMEM((1, tile_q), jnp.float32),   # running max m
                pltpu.VMEM((1, tile_q), jnp.float32),   # running sum l
                pltpu.VMEM((1, tile_q), jnp.float32),   # target logit
            ],
        ),
        compiler_params=pltpu.CompilerParams(
            dimension_semantics=("parallel", "arbitrary")),
    )(z, z)

    # reduction='mean' over the n per-row losses (tiny final op).
    return jnp.mean(losses.reshape(n))


def _reference(x, weight, bias, temperature):
    y = x.astype(jnp.float32) @ weight.T.astype(jnp.float32) + bias.astype(jnp.float32)
    norm = jnp.sqrt(jnp.sum(y * y, axis=-1, keepdims=True))
    z = y / jnp.maximum(norm, 1e-12)
    s = (z @ z.T) / temperature
    n = x.shape[0]
    s = jnp.where(jnp.eye(n, dtype=bool), -jnp.inf, s)
    tgt = jnp.arange(n) ^ 1
    lse = jax.nn.logsumexp(s, axis=-1)
    return jnp.mean(lse - s[jnp.arange(n), tgt])


if __name__ == "__main__":
    n, d, e = 256, 64, 64   # 128 contrastive pairs, hidden dim 64, embed dim 64
    key = jax.random.PRNGKey(0)
    kx, kw, kb = jax.random.split(key, 3)

    x = jax.random.normal(kx, (n, d), dtype=jnp.float32)
    # Deterministic nn.Linear(dim, embed_dim)-style init: U(-1/sqrt(d), 1/sqrt(d)).
    bound = 1.0 / (d ** 0.5)
    weight = jax.random.uniform(kw, (e, d), jnp.float32, -bound, bound)
    bias = jax.random.uniform(kb, (e,), jnp.float32, -bound, bound)

    out = nce_loss_forward(x, weight, bias, temperature=1.0,
                           tile_q=128, tile_k=128)   # grid (2, 2) exercises tiling
    jax.block_until_ready(out)

    ref = _reference(x, weight, bias, 1.0)
    assert jnp.allclose(out, ref, rtol=1e-4, atol=1e-4), (out, ref)
    print("KERNEL_OK")
</pallas_src>

<mosaic_0001>
module attributes {stable_mosaic.version = 11 : i64} {
  func.func @_project_normalize_kernel(%arg0: i32, %arg1: memref<128x64xf32, #tpu.memory_space<vmem>>, %arg2: memref<64x64xf32, #tpu.memory_space<vmem>>, %arg3: memref<1x64xf32, #tpu.memory_space<vmem>>, %arg4: memref<128x64xf32, #tpu.memory_space<vmem>>) attributes {dimension_semantics = [#tpu.dimension_semantics<parallel>], iteration_bounds = array<i64: 2>, scalar_prefetch = 0 : i64, scratch_operands = 0 : i64, tpu.core_type = #tpu.core_type<tc>, window_params = [{transform_indices = @transform_0, window_bounds = array<i64: 128, 64>}, {pipeline_mode = #tpu.pipeline_mode<synchronous>, transform_indices = @transform_1, window_bounds = array<i64: 64, 64>}, {pipeline_mode = #tpu.pipeline_mode<synchronous>, transform_indices = @transform_2, window_bounds = array<i64: 1, 64>}, {transform_indices = @transform_3, window_bounds = array<i64: 128, 64>}]} {
    %c0 = arith.constant 0 : index
    %c0_0 = arith.constant 0 : index
    %0 = vector.load %arg1[%c0, %c0_0] : memref<128x64xf32, #tpu.memory_space<vmem>>, vector<128x64xf32>
    %c0_1 = arith.constant 0 : index
    %c0_2 = arith.constant 0 : index
    %1 = vector.load %arg2[%c0_1, %c0_2] : memref<64x64xf32, #tpu.memory_space<vmem>>, vector<64x64xf32>
    %cst = arith.constant dense<0.000000e+00> : vector<128x64xf32>
    %2 = tpu.matmul %0, %1, %cst {dimension_numbers = #tpu.dot_dimension_numbers<[1], [0], [0], [1], [0, 0, 1, 1], [], []>} : vector<128x64xf32>, vector<64x64xf32>, vector<128x64xf32> -> vector<128x64xf32>
    %c0_3 = arith.constant 0 : index
    %c0_4 = arith.constant 0 : index
    %3 = vector.load %arg3[%c0_3, %c0_4] : memref<1x64xf32, #tpu.memory_space<vmem>>, vector<1x64xf32>
    %4 = vector.broadcast %3 : vector<1x64xf32> to vector<128x64xf32>
    %5 = arith.addf %2, %4 : vector<128x64xf32>
    %6 = arith.mulf %5, %5 : vector<128x64xf32>
    %cst_5 = arith.constant dense<0.000000e+00> : vector<128xf32>
    %7 = vector.multi_reduction <add>, %6, %cst_5 [1] : vector<128x64xf32> to vector<128xf32>
    %8 = vector.shape_cast %7 : vector<128xf32> to vector<128x1xf32>
    %9 = math.sqrt %8 : vector<128x1xf32>
    %cst_6 = arith.constant 9.99999996E-13 : f32
    %10 = vector.broadcast %cst_6 : f32 to vector<128x1xf32>
    %11 = arith.maximumf %9, %10 : vector<128x1xf32>
    %12 = vector.broadcast %11 : vector<128x1xf32> to vector<128x64xf32>
    %13 = arith.divf %5, %12 : vector<128x64xf32>
    %c0_7 = arith.constant 0 : index
    %c0_8 = arith.constant 0 : index
    %14 = vector.load %arg4[%c0_7, %c0_8] : memref<128x64xf32, #tpu.memory_space<vmem>>, vector<128x64xf32>
    tpu.vector_store %arg4[%c0_7, %c0_8], %13 {strides = array<i32>} : memref<128x64xf32, #tpu.memory_space<vmem>>, vector<128x64xf32>,
    return
  }
  func.func @transform_0(%arg0: i32) -> (i32, i32) {
    %c0_i32 = arith.constant 0 : i32
    %c0_i32_0 = arith.constant 0 : i32
    return %arg0, %c0_i32 : i32, i32
  }
  func.func @transform_1(%arg0: i32) -> (i32, i32) {
    %c0_i32 = arith.constant 0 : i32
    %c0_i32_0 = arith.constant 0 : i32
    %c0_i32_1 = arith.constant 0 : i32
    return %c0_i32, %c0_i32_0 : i32, i32
  }
  func.func @transform_2(%arg0: i32) -> (i32, i32) {
    %c0_i32 = arith.constant 0 : i32
    %c0_i32_0 = arith.constant 0 : i32
    %c0_i32_1 = arith.constant 0 : i32
    return %c0_i32, %c0_i32_0 : i32, i32
  }
  func.func @transform_3(%arg0: i32) -> (i32, i32) {
    %c0_i32 = arith.constant 0 : i32
    %c0_i32_0 = arith.constant 0 : i32
    return %arg0, %c0_i32 : i32, i32
  }
}

</mosaic_0001>

<bundles_post_ra>
// kernel: tpu_custom_call.1
= control target key start
LH: loop header
LB: loop body
LE: loop exit
PB: predicated region body
PF: predicated region fallthrough
CT: control target
= control target key end

     0   :  { %s903_s12 = smov 0   ;;  %s1254_s0 = inlined_call_operand.vmem [shape: f32[256,64], index: 0, kind: input, shape index: {}]   ;;  %s1255_s1 = inlined_call_operand.vmem [shape: f32[64,64], index: 1, kind: input, shape index: {}]   ;;  %s1256_s2 = inlined_call_operand.vmem [shape: f32[1,64], index: 2, kind: input, shape index: {}]   ;;  %s1257_s3 = inlined_call_operand.vmem [shape: f32[256,64], index: 3, kind: output, shape index: {}]  }
   0x1 LB: > { %s695_s13 = sadd.s32 4294967295, %s881_s12   ;;  %p699_p0 = scmp.ge.s32.totalorder %s881_s12, 1  ;;  %s881_s12 = sphi %s903_s12, %s13_s12  }
   0x2   : > { %p138_p1 = scmp.lt.s32.totalorder %s881_s12, 3 }
   0x4   : > { %p139_p2 = pnand %p699_p0, %p138_p1 }
   0x5   : > { %s700_s18 = sshll.u32 (!%p139_p2), %s695_s13, 4 }
   0x6   : > { %142 = sbr.rel (%p139_p2) target bundleno = 436 (0x1b4), region = 32  ;;  %p163_p3 = scmp.lt.s32.totalorder (!%p139_p2), %s700_s18, 31 }
   0xb   : > { %v197_v0 = vld [vmem:[%s1255_s1 + $0x38] sm:$0xff]  ;;  %v196_v1 = vld [vmem:[%s1255_s1 + $0x30] sm:$0xff]  ;;  %v195_v2 = vld [vmem:[%s1255_s1 + $0x28] sm:$0xff]  ;;  %s1259_s18 = smov (!%p163_p3, %s700_s18), 31  ;;  %vm205_vm0 = vcmask 523264  }
   0xc   : > { %747 = vmatprep.subr.mxu0 %v197_v0  ;;  %787 = vmatprep.subr.mxu1 %v197_v0  ;;  %v194_v3 = vld [vmem:[%s1255_s1 + $0x20] sm:$0xff]  ;;  %v193_v4 = vld [vmem:[%s1255_s1 + $0x18] sm:$0xff]  ;;  %v192_v5 = vld [vmem:[%s1255_s1 + $0x10] sm:$0xff]  ;;  %s701_s27 = sshll.u32 %s1259_s18, 3 }
   0xd   : > { %748 = vmatpush3.msra.mxu0 %v197_v0  ;;  %795 = vmatpush3.msra.mxu1 %v197_v0  ;;  %v191_v6 = vld [vmem:[%s1255_s1 + $0x8] sm:$0xff]  ;;  %s940_s5 = scalar_lea.vmem %s1254_s0, %s701_s27  ;;  %v190_v7 = vld [vmem:[%s1255_s1] sm:$0xff]  ;;  %s1166_s13 = scalar_lea.vmem %s1257_s3, %s701_s27 }
   0xe   : > { %749 = vmatprep.subr.mxu0 %v196_v1  ;;  %788 = vmatprep.subr.mxu1 %v196_v1  ;;  %v174_v8 = vld [vmem:[%s940_s5] sm:$0xff]  ;;  %v175_v10 = vld [vmem:[%s940_s5 + $0x8] sm:$0xff]  ;;  %v176_v12 = vld [vmem:[%s940_s5 + $0x10] sm:$0xff] }
   0xf   : > { %750 = vmatpush3.msra.mxu0 %v196_v1  ;;  %796 = vmatpush3.msra.mxu1 %v196_v1  ;;  %v182_v9 = vld [vmem:[%s940_s5 + $0x40] sm:$0xff]  ;;  %v183_v11 = vld [vmem:[%s940_s5 + $0x48] sm:$0xff]  ;;  %v184_v13 = vld [vmem:[%s940_s5 + $0x50] sm:$0xff] }
  0x10   : > { %751 = vmatprep.subr.mxu0 %v195_v2  ;;  %789 = vmatprep.subr.mxu1 %v195_v2  ;;  %v177_v14 = vld [vmem:[%s940_s5 + $0x18] sm:$0xff]  ;;  %v178_v16 = vld [vmem:[%s940_s5 + $0x20] sm:$0xff]  ;;  %v179_v18 = vld [vmem:[%s940_s5 + $0x28] sm:$0xff] }
  0x11   : > { %752 = vmatpush3.msra.mxu0 %v195_v2  ;;  %797 = vmatpush3.msra.mxu1 %v195_v2  ;;  %v185_v15 = vld [vmem:[%s940_s5 + $0x58] sm:$0xff]  ;;  %v186_v17 = vld [vmem:[%s940_s5 + $0x60] sm:$0xff]  ;;  %v187_v19 = vld [vmem:[%s940_s5 + $0x68] sm:$0xff] }
  0x12   : > { %753 = vmatprep.subr.mxu0 %v194_v3  ;;  %790 = vmatprep.subr.mxu1 %v194_v3  ;;  %v180_v20 = vld [vmem:[%s940_s5 + $0x30] sm:$0xff]  ;;  %v181_v22 = vld [vmem:[%s940_s5 + $0x38] sm:$0xff]  ;;  %v980_v24 = vld [vmem:[%s1256_s2] ss:$0 sm:$0xff] }
  0x13   : > { %754 = vmatpush3.msra.mxu0 %v194_v3  ;;  %798 = vmatpush3.msra.mxu1 %v194_v3  ;;  %v188_v21 = vld [vmem:[%s940_s5 + $0x70] sm:$0xff]  ;;  %v189_v23 = vld [vmem:[%s940_s5 + $0x78] sm:$0xff] }
  0x14   : > { %755 = vmatprep.subr.mxu0 %v193_v4  ;;  %791 = vmatprep.subr.mxu1 %v193_v4 }
  0x15   : > { %756 = vmatpush3.msra.mxu0 %v193_v4  ;;  %799 = vmatpush3.msra.mxu1 %v193_v4 }
  0x16   : > { %757 = vmatprep.subr.mxu0 %v192_v5  ;;  %792 = vmatprep.subr.mxu1 %v192_v5 }
  0x17   : > { %758 = vmatpush3.msra.mxu0 %v192_v5  ;;  %800 = vmatpush3.msra.mxu1 %v192_v5 }
  0x18   : > { %759 = vmatprep.subr.mxu0 %v191_v6  ;;  %793 = vmatprep.subr.mxu1 %v191_v6 }
  0x19   : > { %760 = vmatpush3.msra.mxu0 %v191_v6  ;;  %801 = vmatpush3.msra.mxu1 %v191_v6 }
  0x1a   : > { %761 = vmatprep.subr.mxu0 %v190_v7  ;;  %794 = vmatprep.subr.mxu1 %v190_v7 }
  0x1b   : > { %762 = vmatpush3.msra.mxu0 %v190_v7  ;;  %802 = vmatpush3.msra.mxu1 %v190_v7 }
  0x1c   : > { %763 = vmatprep.mubr.msk.f32.mxu0 %vm205_vm0, %v174_v8  ;;  %775 = vmatprep.mubr.msk.f32.mxu1 %vm205_vm0, %v182_v9 }
  0x1d   : > { %764 = vmatmul.mubr.msk.f32.vlgmr.msra.gmra.mxu0 %vm205_vm0, %v175_v10  ;;  %776 = vmatmul.mubr.msk.f32.vlgmr.msra.gmra.mxu1 %vm205_vm0, %v183_v11 }
  0x1e   : > { %766 = vmatprep.mubr.msk.f32.mxu0 %vm205_vm0, %v176_v12  ;;  %778 = vmatprep.mubr.msk.f32.mxu1 %vm205_vm0, %v184_v13 }
  0x21   : > { %767 = vmatmul.mubr.msk.f32.gmra.mxu0 %vm205_vm0, %v177_v14  ;;  %779 = vmatmul.mubr.msk.f32.gmra.mxu1 %vm205_vm0, %v185_v15 }
  0x22   : > { %769 = vmatprep.mubr.msk.f32.mxu0 %vm205_vm0, %v178_v16  ;;  %781 = vmatprep.mubr.msk.f32.mxu1 %vm205_vm0, %v186_v17 }
  0x25   : > { %770 = vmatmul.mubr.msk.f32.gmra.mxu0 %vm205_vm0, %v179_v18  ;;  %782 = vmatmul.mubr.msk.f32.gmra.mxu1 %vm205_vm0, %v187_v19 }
  0x26   : > { %772 = vmatprep.mubr.msk.f32.mxu0 %vm205_vm0, %v180_v20  ;;  %784 = vmatprep.mubr.msk.f32.mxu1 %vm205_vm0, %v188_v21 }
  0x29   : > { %773 = vmatmul.mubr.msk.f32.gmra.mxu0 %vm205_vm0, %v181_v22  ;;  %785 = vmatmul.mubr.msk.f32.gmra.mxu1 %vm205_vm0, %v189_v23 }
  0xdd   : > { %v765_v25 = vpop.f32.mrf.mxu0  ;;  %v777_v26 = vpop.f32.mrf.mxu1 }
  0xde   : > { %v983_v27 = vadd.f32 %v765_v25, %v980_v24  ;;  %v986_v28 = vadd.f32 %v777_v26, %v980_v24 }
  0xdf   : > { %v320_v29 = vpop.f32.mrf.mxu0  ;;  %v360_v30 = vpop.f32.mrf.mxu1 }
  0xe0   : > { %v989_v31 = vadd.f32 %v980_v24, %v320_v29  ;;  %v408_v32 = vmul.f32 %v986_v28, %v986_v28  ;;  %v400_v33 = vmul.f32 %v983_v27, %v983_v27  ;;  %v996_v34 = vadd.f32 %v980_v24, %v360_v30 }
  0xe1   : > { %v768_v35 = vpop.f32.mrf.mxu0  ;;  %v780_v36 = vpop.f32.mrf.mxu1 }
  0xe2   : > { %v999_v37 = vadd.f32 %v768_v35, %v980_v24  ;;  %v442_v38 = vsel %vm205_vm0, %v408_v32, 0.0  ;;  %v1003_v39 = vadd.f32 %v780_v36, %v980_v24  ;;  %v418_v40 = vsel %vm205_vm0, %v400_v33, 0.0 }
  0xe3   : > { %443 = vadd.xlane.f32.xlu1 %v442_v38  ;;  %419 = vadd.xlane.f32.xlu0 %v418_v40  ;;  %v330_v41 = vpop.f32.mrf.mxu0  ;;  %v370_v42 = vpop.f32.mrf.mxu1  ;;  %v399_v43 = vmul.f32 %v989_v31, %v989_v31  ;;  %v407_v47 = vmul.f32 %v996_v34, %v996_v34 }
  0xe4   : > { %v402_v44 = vmul.f32 %v999_v37, %v999_v37  ;;  %v410_v45 = vmul.f32 %v1003_v39, %v1003_v39  ;;  %v1015_v48 = vadd.f32 %v980_v24, %v330_v41  ;;  %v1018_v49 = vadd.f32 %v980_v24, %v370_v42 }
  0xe5   : > { %v771_v46 = vpop.f32.mrf.mxu0  ;;  %v415_v51 = vsel %vm205_vm0, %v399_v43, 0.0  ;;  %v783_v52 = vpop.f32.mrf.mxu1  ;;  %v439_v55 = vsel %vm205_vm0, %v407_v47, 0.0 }
  0xe6   : > { %v424_v50 = vsel %vm205_vm0, %v402_v44, 0.0  ;;  %v448_v54 = vsel %vm205_vm0, %v410_v45, 0.0  ;;  %v1025_v56 = vadd.f32 %v771_v46, %v980_v24  ;;  %v401_v59 = vmul.f32 %v1015_v48, %v1015_v48 }
  0xe7   : > { %425 = vadd.xlane.f32.xlu1 %v424_v50  ;;  %416 = vadd.xlane.f32.xlu0 %v415_v51  ;;  %v340_v53 = vpop.f32.mrf.mxu0  ;;  %v380_v58 = vpop.f32.mrf.mxu1  ;;  %v409_v60 = vmul.f32 %v1018_v49, %v1018_v49  ;;  %v1035_v62 = vadd.f32 %v783_v52, %v980_v24 }
  0xe8   : > { %v1028_v57 = vadd.f32 %v980_v24, %v340_v53  ;;  %v1038_v63 = vadd.f32 %v980_v24, %v380_v58  ;;  %v421_v0 = vsel %vm205_vm0, %v401_v59, 0.0  ;;  %v404_v2 = vmul.f32 %v1025_v56, %v1025_v56 }
  0xe9   : > { %v774_v61 = vpop.f32.mrf.mxu0  ;;  %v445_v1 = vsel %vm205_vm0, %v409_v60, 0.0  ;;  %v786_v5 = vpop.f32.mrf.mxu1  ;;  %v412_v7 = vmul.f32 %v1035_v62, %v1035_v62 }
  0xea   : > { %v403_v3 = vmul.f32 %v1028_v57, %v1028_v57  ;;  %v1047_v6 = vadd.f32 %v774_v61, %v980_v24  ;;  %v430_v9 = vsel %vm205_vm0, %v404_v2, 0.0  ;;  %v411_v11 = vmul.f32 %v1038_v63, %v1038_v63 }
  0xeb   : > { %449 = vadd.xlane.f32.xlu1 %v448_v54  ;;  %440 = vadd.xlane.f32.xlu0 %v439_v55  ;;  %v350_v4 = vpop.f32.mrf.mxu0  ;;  %v390_v12 = vpop.f32.mrf.mxu1  ;;  %v1059_v13 = vadd.f32 %v786_v5, %v980_v24  ;;  %v454_v14 = vsel %vm205_vm0, %v412_v7, 0.0 }
  0xec   : > { %v1052_v8 = vadd.f32 %v980_v24, %v350_v4  ;;  %v427_v10 = vsel %vm205_vm0, %v403_v3, 0.0  ;;  %v1063_v15 = vadd.f32 %v980_v24, %v390_v12  ;;  %v451_v16 = vsel %vm205_vm0, %v411_v11, 0.0 }
  0xed   : > { %v406_v17 = vmul.f32 %v1047_v6, %v1047_v6  ;;  %v414_v21 = vmul.f32 %v1059_v13, %v1059_v13 }
  0xee   : > { %v405_v18 = vmul.f32 %v1052_v8, %v1052_v8  ;;  %v413_v22 = vmul.f32 %v1063_v15, %v1063_v15 }
  0xef   : > { %422 = vadd.xlane.f32.xlu1 %v421_v0  ;;  %446 = vadd.xlane.f32.xlu0 %v445_v1  ;;  %v436_v19 = vsel %vm205_vm0, %v406_v17, 0.0  ;;  %v460_v23 = vsel %vm205_vm0, %v414_v21, 0.0 }
  0xf0   : > { %v433_v20 = vsel %vm205_vm0, %v405_v18, 0.0  ;;  %v457_v24 = vsel %vm205_vm0, %v413_v22, 0.0 }
  0xf3   : > { %431 = vadd.xlane.f32.xlu1 %v430_v9  ;;  %428 = vadd.xlane.f32.xlu0 %v427_v10 }
  0xf7   : > { %455 = vadd.xlane.f32.xlu1 %v454_v14  ;;  %452 = vadd.xlane.f32.xlu0 %v451_v16 }
  0xfb   : > { %437 = vadd.xlane.f32.xlu1 %v436_v19  ;;  %434 = vadd.xlane.f32.xlu0 %v433_v20 }
  0xff   : > { %461 = vadd.xlane.f32.xlu1 %v460_v23  ;;  %458 = vadd.xlane.f32.xlu0 %v457_v24 }
 0x16c   : > { %v444_v25 = vpop.xlane.xlu1 %443  ;;  %v420_v26 = vpop.xlane.xlu0 %419 }
 0x16d   : > { %811 = vrsqrt.f32 %v444_v25  ;;  %vm528_vm1 = vcmp.eq.f32.partialorder %v444_v25, inf  ;;  %vm530_vm2 = vcmp.eq.f32.partialorder %v444_v25, 0.0  ;;  %v531_v42 = vand.u32 2147483648, %v444_v25 }
 0x16e   : > { %813 = vrsqrt.f32 %v420_v26  ;;  %vm472_vm3 = vcmp.eq.f32.partialorder %v420_v26, inf  ;;  %vm474_vm4 = vcmp.eq.f32.partialorder %v420_v26, 0.0  ;;  %v475_v44 = vand.u32 2147483648, %v420_v26 }
 0x170   : > { %v426_v29 = vpop.xlane.xlu1 %425  ;;  %v417_v30 = vpop.xlane.xlu0 %416 }
 0x171   : > { %815 = vrsqrt.f32 %v426_v29  ;;  %vm486_vm5 = vcmp.eq.f32.partialorder %v426_v29, inf  ;;  %vm488_vm6 = vcmp.eq.f32.partialorder %v426_v29, 0.0  ;;  %v489_v50 = vand.u32 2147483648, %v426_v29 }
 0x172   : > { %817 = vrsqrt.f32 %v417_v30  ;;  %vm465_vm7 = vcmp.eq.f32.partialorder %v417_v30, inf  ;;  %vm467_vm8 = vcmp.eq.f32.partialorder %v417_v30, 0.0  ;;  %v468_v60 = vand.u32 2147483648, %v417_v30 }
 0x174   : > { %v1078_v32 = vpop.xlane.xlu1 %449  ;;  %v1080_v33 = vpop.xlane.xlu0 %440 }
 0x175   : > { %819 = vrsqrt.f32 %v1078_v32  ;;  %vm542_vm9 = vcmp.eq.f32.partialorder %v1078_v32, inf  ;;  %vm544_vm10 = vcmp.eq.f32.partialorder %v1078_v32, 0.0  ;;  %v545_v4 = vand.u32 2147483648, %v1078_v32 }
 0x176   : > { %821 = vrsqrt.f32 %v1080_v33  ;;  %vm521_vm11 = vcmp.eq.f32.partialorder %v1080_v33, inf  ;;  %vm523_vm12 = vcmp.eq.f32.partialorder %v1080_v33, 0.0  ;;  %v524_v18 = vand.u32 2147483648, %v1080_v33 }
 0x178   : > { %v1084_v35 = vpop.xlane.xlu1 %422  ;;  %v1086_v36 = vpop.xlane.xlu0 %446 }
 0x179   : > { %823 = vrsqrt.f32 %v1084_v35  ;;  %vm479_vm13 = vcmp.eq.f32.partialorder %v1084_v35, inf  ;;  %vm481_vm14 = vcmp.eq.f32.partialorder %v1084_v35, 0.0  ;;  %v482_v24 = vand.u32 2147483648, %v1084_v35 }
 0x17a   : > { %v812_v38 = vpop.eup %811  ;;  %825 = vrsqrt.f32 %v1086_v36  ;;  %vm535_vm15 = vcmp.eq.f32.partialorder %v1086_v36, inf }
 0x17b   : > { %v814_v40 = vpop.eup %813  ;;  %v527_v41 = vmul.f32 %v812_v38, %v444_v25 }
 0x17c   : > { %v471_v43 = vmul.f32 %v814_v40, %v420_v26  ;;  %v1090_v45 = vpop.xlane.xlu1 %431  ;;  %v1092_v46 = vpop.xlane.xlu0 %428 }
 0x17d   : > { %v529_v47 = vsel %vm528_vm1, %v444_v25, %v527_v41  ;;  %827 = vrsqrt.f32 %v1090_v45  ;;  %vm537_vm1 = vcmp.eq.f32.partialorder %v1086_v36, 0.0 }
 0x17e   : > { %v816_v51 = vpop.eup %815  ;;  %v532_v52 = vsel %vm530_vm2, %v531_v42, %v529_v47  ;;  %v473_v53 = vsel %vm472_vm3, %v420_v26, %v471_v43  ;;  %829 = vrsqrt.f32 %v1092_v46  ;;  %v538_v42 = vand.u32 2147483648, %v1086_v36 }
 0x17f   : > { %v818_v54 = vpop.eup %817  ;;  %v584_v55 = vmax.f32 %v532_v52, 1e-12  ;;  %v476_v58 = vsel %vm474_vm4, %v475_v44, %v473_v53  ;;  %v485_v59 = vmul.f32 %v816_v51, %v426_v29  ;;  %vm500_vm2 = vcmp.eq.f32.partialorder %v1090_v45, inf }
 0x180   : > { %v576_v61 = vmax.f32 %v476_v58, 1e-12  ;;  %v464_v0 = vmul.f32 %v818_v54, %v417_v30  ;;  %v1100_v1 = vpop.xlane.xlu1 %455  ;;  %v1102_v2 = vpop.xlane.xlu0 %452  ;;  %vm502_vm3 = vcmp.eq.f32.partialorder %v1090_v45, 0.0  ;;  %vm493_vm4 = vcmp.eq.f32.partialorder %v1092_v46, inf }
 0x181   : > { %831 = vrcp.f32 %v584_v55  ;;  %v487_v3 = vsel %vm486_vm5, %v426_v29, %v485_v59  ;;  %v503_v55 = vand.u32 2147483648, %v1090_v45  ;;  %v496_v59 = vand.u32 2147483648, %v1092_v46 }
 0x182   : > { %v820_v5 = vpop.eup %819  ;;  %833 = vrcp.f32 %v576_v61  ;;  %v490_v7 = vsel %vm488_vm6, %v489_v50, %v487_v3  ;;  %v466_v9 = vsel %vm465_vm7, %v417_v30, %v464_v0  ;;  %vm495_vm5 = vcmp.eq.f32.partialorder %v1092_v46, 0.0 }
 0x183   : > { %v822_v10 = vpop.eup %821  ;;  %v578_v11 = vmax.f32 %v490_v7, 1e-12  ;;  %v469_v12 = vsel %vm467_vm8, %v468_v60, %v466_v9  ;;  %v541_v14 = vmul.f32 %v820_v5, %v1078_v32  ;;  %835 = vrsqrt.f32 %v1100_v1 }
 0x184   : > { %v575_v16 = vmax.f32 %v469_v12, 1e-12  ;;  %v520_v17 = vmul.f32 %v822_v10, %v1080_v33  ;;  %837 = vrsqrt.f32 %v1102_v2  ;;  %v1116_v19 = vpop.xlane.xlu1 %437  ;;  %v1129_v25 = vpop.xlane.xlu0 %434  ;;  %vm556_vm6 = vcmp.eq.f32.partialorder %v1100_v1, inf }
 0x185   : > { %839 = vrcp.f32 %v578_v11  ;;  %v543_v20 = vsel %vm542_vm9, %v1078_v32, %v541_v14  ;;  %vm558_vm7 = vcmp.eq.f32.partialorder %v1100_v1, 0.0  ;;  %vm549_vm8 = vcmp.eq.f32.partialorder %v1102_v2, inf }
 0x186   : > { %v824_v21 = vpop.eup %823  ;;  %841 = vrcp.f32 %v575_v16  ;;  %v546_v22 = vsel %vm544_vm10, %v545_v4, %v543_v20  ;;  %v522_v23 = vsel %vm521_vm11, %v1080_v33, %v520_v17  ;;  %vm551_vm9 = vcmp.eq.f32.partialorder %v1102_v2, 0.0 }
 0x187   : > { %v826_v26 = vpop.eup %825  ;;  %v586_v29 = vmax.f32 %v546_v22, 1e-12  ;;  %v525_v30 = vsel %vm523_vm12, %v524_v18, %v522_v23  ;;  %v478_v38 = vmul.f32 %v824_v21, %v1084_v35  ;;  %843 = vrsqrt.f32 %v1116_v19 }
 0x188   : > { %v583_v40 = vmax.f32 %v525_v30, 1e-12  ;;  %v534_v32 = vmul.f32 %v826_v26, %v1086_v36  ;;  %v1143_v33 = vpop.xlane.xlu1 %461  ;;  %v552_v18 = vand.u32 2147483648, %v1102_v2  ;;  %vm514_vm10 = vcmp.eq.f32.partialorder %v1116_v19, inf }
 0x189   : > { %845 = vrcp.f32 %v586_v29  ;;  %v480_v41 = vsel %vm479_vm13, %v1084_v35, %v478_v38  ;;  %v1154_v35 = vpop.xlane.xlu0 %458  ;;  %vm516_vm11 = vcmp.eq.f32.partialorder %v1116_v19, 0.0  ;;  %vm507_vm12 = vcmp.eq.f32.partialorder %v1129_v25, inf }
 0x18a   : > { %v828_v43 = vpop.eup %827  ;;  %847 = vrcp.f32 %v583_v40  ;;  %v483_v44 = vsel %vm481_vm14, %v482_v24, %v480_v41  ;;  %v536_v47 = vsel %vm535_vm15, %v1086_v36, %v534_v32  ;;  %vm509_vm13 = vcmp.eq.f32.partialorder %v1129_v25, 0.0 }
 0x18b   : > { %v830_v50 = vpop.eup %829  ;;  %v577_v51 = vmax.f32 %v483_v44, 1e-12  ;;  %v539_v52 = vsel %vm537_vm1, %v538_v42, %v536_v47  ;;  %v499_v53 = vmul.f32 %v828_v43, %v1090_v45  ;;  %849 = vrsqrt.f32 %v1129_v25 }
 0x18c   : > { %v585_v54 = vmax.f32 %v539_v52, 1e-12  ;;  %v492_v58 = vmul.f32 %v830_v50, %v1092_v46  ;;  %851 = vrsqrt.f32 %v1143_v33  ;;  %vm570_vm14 = vcmp.eq.f32.partialorder %v1143_v33, inf }
 0x18d   : > { %853 = vrcp.f32 %v577_v51  ;;  %v501_v36 = vsel %vm500_vm2, %v1090_v45, %v499_v53  ;;  %v573_v52 = vand.u32 2147483648, %v1143_v33  ;;  %vm572_vm15 = vcmp.eq.f32.partialorder %v1143_v33, 0.0 }
 0x18e   : > { %v832_v60 = vpop.eup %831  ;;  %855 = vrcp.f32 %v585_v54  ;;  %v504_v61 = vsel %vm502_vm3, %v503_v55, %v501_v36  ;;  %v494_v0 = vsel %vm493_vm4, %v1092_v46, %v492_v58  ;;  %vm563_vm1 = vcmp.eq.f32.partialorder %v1154_v35, inf }
 0x18f   : > { %v834_v3 = vpop.eup %833  ;;  %v610_v4 = vmul.f32 %v832_v60, %v986_v28  ;;  %v580_v5 = vmax.f32 %v504_v61, 1e-12  ;;  %v497_v7 = vsel %vm495_vm5, %v496_v59, %v494_v0  ;;  %857 = vrsqrt.f32 %v1154_v35 }
 0x190   : > { %v836_v9 = vpop.eup %835  ;;  %v594_v10 = vmul.f32 %v834_v3, %v983_v27  ;;  %v579_v11 = vmax.f32 %v497_v7, 1e-12  ;;  %v559_v28 = vand.u32 2147483648, %v1100_v1  ;;  %vm565_vm2 = vcmp.eq.f32.partialorder %v1154_v35, 0.0 }
 0x191   : > { %v838_v12 = vpop.eup %837  ;;  %632 = vst.msk [vmem:[%s1166_s13 + $0x48] sm:$0xff] %vm205_vm0, %v610_v4  ;;  %859 = vrcp.f32 %v580_v5  ;;  %v555_v45 = vmul.f32 %v836_v9, %v1100_v1 }
 0x192   : > { %v840_v46 = vpop.eup %839  ;;  %624 = vst.msk [vmem:[%s1166_s13 + $0x8] sm:$0xff] %vm205_vm0, %v594_v10  ;;  %861 = vrcp.f32 %v579_v11  ;;  %v548_v27 = vmul.f32 %v838_v12, %v1102_v2 }
 0x193   : > { %v842_v14 = vpop.eup %841  ;;  %v598_v16 = vmul.f32 %v840_v46, %v999_v37  ;;  %v557_v17 = vsel %vm556_vm6, %v1100_v1, %v555_v45 }
 0x194   : > { %v844_v20 = vpop.eup %843  ;;  %v592_v21 = vmul.f32 %v842_v14, %v989_v31  ;;  %v560_v22 = vsel %vm558_vm7, %v559_v28, %v557_v17  ;;  %v550_v23 = vsel %vm549_vm8, %v1102_v2, %v548_v27  ;;  %v517_v31 = vand.u32 2147483648, %v1116_v19 }
 0x195   : > { %626 = vst.msk [vmem:[%s1166_s13 + $0x18] sm:$0xff] %vm205_vm0, %v598_v16  ;;  %v588_v24 = vmax.f32 %v560_v22, 1e-12  ;;  %v553_v26 = vsel %vm551_vm9, %v552_v18, %v550_v23  ;;  %v513_v37 = vmul.f32 %v844_v20, %v1116_v19 }
 0x196   : > { %v846_v1 = vpop.eup %845  ;;  %623 = vst.msk [vmem:[%s1166_s13] sm:$0xff] %vm205_vm0, %v592_v21  ;;  %v587_v29 = vmax.f32 %v553_v26, 1e-12 }
 0x197   : > { %v848_v30 = vpop.eup %847  ;;  %v614_v38 = vmul.f32 %v846_v1, %v1003_v39  ;;  %863 = vrcp.f32 %v588_v24  ;;  %v515_v2 = vsel %vm514_vm10, %v1116_v19, %v513_v37  ;;  %v510_v39 = vand.u32 2147483648, %v1129_v25 }
 0x198   : > { %v850_v40 = vpop.eup %849  ;;  %v608_v32 = vmul.f32 %v848_v30, %v996_v34  ;;  %865 = vrcp.f32 %v587_v29  ;;  %v518_v41 = vsel %vm516_vm11, %v517_v31, %v515_v2 }
 0x199   : > { %v852_v42 = vpop.eup %851  ;;  %634 = vst.msk [vmem:[%s1166_s13 + $0x58] sm:$0xff] %vm205_vm0, %v614_v38  ;;  %v582_v43 = vmax.f32 %v518_v41, 1e-12  ;;  %v506_v44 = vmul.f32 %v850_v40, %v1129_v25 }
 0x19a   : > { %v854_v47 = vpop.eup %853  ;;  %631 = vst.msk [vmem:[%s1166_s13 + $0x40] sm:$0xff] %vm205_vm0, %v608_v32  ;;  %v569_v34 = vmul.f32 %v852_v42, %v1143_v33 }
 0x19b   : > { %v856_v19 = vpop.eup %855  ;;  %v596_v50 = vmul.f32 %v854_v47, %v1015_v48  ;;  %867 = vrcp.f32 %v582_v43  ;;  %v508_v51 = vsel %vm507_vm12, %v1129_v25, %v506_v44 }
 0x19c   : > { %v858_v53 = vpop.eup %857  ;;  %v612_v54 = vmul.f32 %v856_v19, %v1018_v49  ;;  %v511_v55 = vsel %vm509_vm13, %v510_v39, %v508_v51  ;;  %v571_v58 = vsel %vm570_vm14, %v1143_v33, %v569_v34  ;;  %v566_v49 = vand.u32 2147483648, %v1154_v35 }
 0x19d   : > { %625 = vst.msk [vmem:[%s1166_s13 + $0x10] sm:$0xff] %vm205_vm0, %v596_v50  ;;  %v581_v36 = vmax.f32 %v511_v55, 1e-12  ;;  %v574_v59 = vsel %vm572_vm15, %v573_v52, %v571_v58  ;;  %v562_v48 = vmul.f32 %v858_v53, %v1154_v35 }
 0x19e   : > { %v860_v60 = vpop.eup %859  ;;  %633 = vst.msk [vmem:[%s1166_s13 + $0x50] sm:$0xff] %vm205_vm0, %v612_v54  ;;  %v590_v25 = vmax.f32 %v574_v59, 1e-12 }
 0x19f   : > { %v862_v61 = vpop.eup %861  ;;  %v602_v33 = vmul.f32 %v860_v60, %v1025_v56  ;;  %869 = vrcp.f32 %v581_v36  ;;  %v564_v0 = vsel %vm563_vm1, %v1154_v35, %v562_v48 }
 0x1a0   : > { %v600_v3 = vmul.f32 %v862_v61, %v1028_v57  ;;  %871 = vrcp.f32 %v590_v25  ;;  %v567_v4 = vsel %vm565_vm2, %v566_v49, %v564_v0 }
 0x1a1   : > { %628 = vst.msk [vmem:[%s1166_s13 + $0x28] sm:$0xff] %vm205_vm0, %v602_v33  ;;  %v589_v5 = vmax.f32 %v567_v4, 1e-12 }
 0x1a2   : > { %627 = vst.msk [vmem:[%s1166_s13 + $0x20] sm:$0xff] %vm205_vm0, %v600_v3 }
 0x1a3   : > { %873 = vrcp.f32 %v589_v5 }
 0x1a4   : > { %v864_v56 = vpop.eup %863 }
 0x1a5   : > { %v866_v7 = vpop.eup %865  ;;  %v618_v9 = vmul.f32 %v864_v56, %v1035_v62 }
 0x1a6   : > { %v616_v35 = vmul.f32 %v866_v7, %v1038_v63 }
 0x1a7   : > { %636 = vst.msk [vmem:[%s1166_s13 + $0x68] sm:$0xff] %vm205_vm0, %v618_v9 }
 0x1a8   : > { %v868_v57 = vpop.eup %867  ;;  %635 = vst.msk [vmem:[%s1166_s13 + $0x60] sm:$0xff] %vm205_vm0, %v616_v35 }
 0x1a9   : > { %v606_v10 = vmul.f32 %v868_v57, %v1047_v6 }
 0x1ab   : > { %630 = vst.msk [vmem:[%s1166_s13 + $0x38] sm:$0xff] %vm205_vm0, %v606_v10 }
 0x1ac   : > { %v870_v11 = vpop.eup %869 }
 0x1ad   : > { %v872_v12 = vpop.eup %871  ;;  %v604_v45 = vmul.f32 %v870_v11, %v1052_v8 }
 0x1ae   : > { %v622_v46 = vmul.f32 %v872_v12, %v1059_v13 }
 0x1af   : > { %629 = vst.msk [vmem:[%s1166_s13 + $0x30] sm:$0xff] %vm205_vm0, %v604_v45 }
 0x1b0   : > { %v874_v62 = vpop.eup %873  ;;  %638 = vst.msk [vmem:[%s1166_s13 + $0x78] sm:$0xff] %vm205_vm0, %v622_v46 }
 0x1b1   : > { %v620_v63 = vmul.f32 %v874_v62, %v1063_v15 }
 0x1b3   : > { %637 = vst.msk [vmem:[%s1166_s13 + $0x70] sm:$0xff] %vm205_vm0, %v620_v63 }
 0x1b4 PF: > { %s13_s12 = sadd.s32 1, %s881_s12  }
 0x1b5   : > { %p10_p4 = scmp.ge.s32.totalorder %s13_s12, 4  }
 0x1b7   :  { %12 = sbr.rel (!%p10_p4) target bundleno = 1 (0x1), region = 62 }

</bundles_post_ra>
